<compile_context>
chip_gen: v7x
topology: tpu7x:2x2x1
jax: 0.10.0
libtpu: 0.0.40
codegen_flags: <defaults>
</compile_context>

<pallas_src>
import jax
import jax.numpy as jnp
from jax.experimental import pallas as pl
from jax.experimental.pallas import tpu as pltpu


HIDDEN = (512, 256, 128, 64, 32)


def ffnn_kernel(x_ref,
                w1_ref, b1_ref, w2_ref, b2_ref, w3_ref, b3_ref,
                w4_ref, b4_ref, w5_ref, b5_ref, w6_ref, b6_ref,
                out_ref):
    # x_ref:   (TB, IN_pad)   bf16 batch tile
    # wK_ref:  (inK, outK)    bf16 transposed weights (VMEM-resident across the grid)
    # bK_ref:  (1, outK)      f32 biases
    # out_ref: (TB, C_pad)    f32 softmax probabilities (lane-dense, C padded to 128)

    def dense_relu(h_bf16, w_ref, b_ref):
        z = jnp.dot(h_bf16, w_ref[...], preferred_element_type=jnp.float32) + b_ref[...]
        # ReLU in f32 on the VPU; cast back to bf16 only as the next MXU operand.
        return jnp.maximum(z, 0.0).astype(jnp.bfloat16)

    h = x_ref[...]                            # (TB, IN_pad) bf16
    h = dense_relu(h, w1_ref, b1_ref)         # (TB, 512)
    # TODO(synk): dropout(p=0.5) after fc1/fc2/fc3 is identity in eval mode; no masking applied.
    h = dense_relu(h, w2_ref, b2_ref)         # (TB, 256)
    h = dense_relu(h, w3_ref, b3_ref)         # (TB, 128)
    h = dense_relu(h, w4_ref, b4_ref)         # (TB, 64)
    h = dense_relu(h, w5_ref, b5_ref)         # (TB, 32)

    # fc6 + softmax. Padded class lanes have -1e30 bias -> exp underflows to exactly 0.
    logits = (jnp.dot(h, w6_ref[...], preferred_element_type=jnp.float32)
              + b6_ref[...])                  # (TB, C_pad) f32
    m = jnp.max(logits, axis=1, keepdims=True)        # XLU lane reduce
    e = jnp.exp(logits - m)                            # EUP
    inv = pl.reciprocal(jnp.sum(e, axis=1, keepdims=True), approx=True)  # EUP slot
    out_ref[...] = e * inv


def ffnn_pallas(x, params, num_classes, *, block_b=128):
    """x: (B, in_features) float32. Mirrors VeryAdvancedFFNN.forward (eval mode)."""
    (w1, b1, w2, b2, w3, b3, w4, b4, w5, b5, w6, b6) = params
    B, IN = x.shape
    C = num_classes
    C_PAD = 128                                          # lane-dense output slab

    # ---- padding sizes ----
    # batch: multiple of 8 (sublane); tile TB divides padded batch
    B_pad = max(8, ((B + 7) // 8) * 8)
    TB = min(block_b, B_pad)
    B_pad = ((B_pad + TB - 1) // TB) * TB
    # input features: multiple of 128 (lane-dense x tile, sublane-aligned w1)
    IN_pad = max(128, ((IN + 127) // 128) * 128)

    # ---- wrapper-side packing (plain JAX) ----
    x_p = jnp.zeros((B_pad, IN_pad), jnp.bfloat16).at[:B, :IN].set(x.astype(jnp.bfloat16))

    to_bf16 = lambda w: w.astype(jnp.bfloat16)
    # zero-pad w1's extra input rows -> padded x columns contribute exactly 0
    w1_p = jnp.zeros((IN_pad, w1.shape[1]), jnp.bfloat16).at[:IN].set(to_bf16(w1))
    w2b, w3b, w4b, w5b = map(to_bf16, (w2, w3, w4, w5))
    # pad fc6: zero weight columns, -1e30 bias for the padded (fake) classes
    w6_p = jnp.zeros((w6.shape[0], C_PAD), jnp.bfloat16).at[:, :C].set(to_bf16(w6))
    b6_p = jnp.full((1, C_PAD), -1e30, jnp.float32).at[:, :C].set(b6)

    weight_args = (w1_p, b1, w2b, b2, w3b, b3, w4b, b4, w5b, b5, w6_p, b6_p)

    def resident_spec(arr):
        # full-extent block, constant block index across the grid -> stays resident in VMEM
        return pl.BlockSpec(arr.shape, lambda i: (0, 0))

    grid = (B_pad // TB,)
    in_specs = [pl.BlockSpec((TB, IN_pad), lambda i: (i, 0))]    # batch-tiled input
    in_specs += [resident_spec(a) for a in weight_args]

    out_p = pl.pallas_call(
        ffnn_kernel,
        out_shape=jax.ShapeDtypeStruct((B_pad, C_PAD), jnp.float32),
        grid=grid,
        in_specs=in_specs,
        out_specs=pl.BlockSpec((TB, C_PAD), lambda i: (i, 0)),
        compiler_params=pltpu.CompilerParams(
            dimension_semantics=("parallel",)),
    )(x_p, *weight_args)

    return out_p[:B, :C]


def init_params(key, in_features, num_classes):
    """nn.Linear-style init: W^T in (fan_in, fan_out), b in (1, fan_out), U(-1/sqrt(fan_in), +)."""
    dims = (in_features,) + HIDDEN + (num_classes,)
    keys = jax.random.split(key, 2 * (len(dims) - 1))
    params = []
    for li in range(len(dims) - 1):
        fan_in, fan_out = dims[li], dims[li + 1]
        s = 1.0 / float(fan_in) ** 0.5
        w_t = jax.random.uniform(keys[2 * li], (fan_in, fan_out), jnp.float32, -s, s)
        b = jax.random.uniform(keys[2 * li + 1], (1, fan_out), jnp.float32, -s, s)
        params += [w_t, b]
    return tuple(params)


def ffnn_reference(x, params):
    """Pure-JAX f32 reference of the PyTorch forward (eval mode)."""
    h = x
    for li in range(6):
        w_t, b = params[2 * li], params[2 * li + 1]
        h = h @ w_t + b
        if li < 5:
            h = jnp.maximum(h, 0.0)
    return jax.nn.softmax(h, axis=1)


if __name__ == "__main__":
    batch = 2
    in_features = 64
    num_classes = 8

    key = jax.random.PRNGKey(0)
    kx, kp = jax.random.split(key)
    x = jax.random.normal(kx, (batch, in_features), jnp.float32)
    params = init_params(kp, in_features, num_classes)

    out = ffnn_pallas(x, params, num_classes)
    out = jax.block_until_ready(out)

    assert out.shape == (batch, num_classes)
    # softmax rows sum to 1 (approx reciprocal -> loose tolerance)
    assert bool(jnp.allclose(jnp.sum(out, axis=1), 1.0, atol=1e-2))
    # matches the f32 reference up to bf16-MXU / approx-reciprocal error
    ref = ffnn_reference(x, params)
    assert bool(jnp.allclose(out, ref, atol=3e-2))
    print("KERNEL_OK")
</pallas_src>

<mosaic_0001>
module attributes {stable_mosaic.version = 11 : i64} {
  func.func @ffnn_kernel(%arg0: i32, %arg1: memref<8x128xbf16, #tpu.memory_space<vmem>>, %arg2: memref<128x512xbf16, #tpu.memory_space<vmem>>, %arg3: memref<1x512xf32, #tpu.memory_space<vmem>>, %arg4: memref<512x256xbf16, #tpu.memory_space<vmem>>, %arg5: memref<1x256xf32, #tpu.memory_space<vmem>>, %arg6: memref<256x128xbf16, #tpu.memory_space<vmem>>, %arg7: memref<1x128xf32, #tpu.memory_space<vmem>>, %arg8: memref<128x64xbf16, #tpu.memory_space<vmem>>, %arg9: memref<1x64xf32, #tpu.memory_space<vmem>>, %arg10: memref<64x32xbf16, #tpu.memory_space<vmem>>, %arg11: memref<1x32xf32, #tpu.memory_space<vmem>>, %arg12: memref<32x128xbf16, #tpu.memory_space<vmem>>, %arg13: memref<1x128xf32, #tpu.memory_space<vmem>>, %arg14: memref<8x128xf32, #tpu.memory_space<vmem>>) attributes {dimension_semantics = [#tpu.dimension_semantics<parallel>], iteration_bounds = array<i64: 1>, scalar_prefetch = 0 : i64, scratch_operands = 0 : i64, tpu.core_type = #tpu.core_type<tc>, window_params = [{transform_indices = @transform_0, window_bounds = array<i64: 8, 128>}, {pipeline_mode = #tpu.pipeline_mode<synchronous>, transform_indices = @transform_1, window_bounds = array<i64: 128, 512>}, {pipeline_mode = #tpu.pipeline_mode<synchronous>, transform_indices = @transform_2, window_bounds = array<i64: 1, 512>}, {pipeline_mode = #tpu.pipeline_mode<synchronous>, transform_indices = @transform_3, window_bounds = array<i64: 512, 256>}, {pipeline_mode = #tpu.pipeline_mode<synchronous>, transform_indices = @transform_4, window_bounds = array<i64: 1, 256>}, {pipeline_mode = #tpu.pipeline_mode<synchronous>, transform_indices = @transform_5, window_bounds = array<i64: 256, 128>}, {pipeline_mode = #tpu.pipeline_mode<synchronous>, transform_indices = @transform_6, window_bounds = array<i64: 1, 128>}, {pipeline_mode = #tpu.pipeline_mode<synchronous>, transform_indices = @transform_7, window_bounds = array<i64: 128, 64>}, {pipeline_mode = #tpu.pipeline_mode<synchronous>, transform_indices = @transform_8, window_bounds = array<i64: 1, 64>}, {pipeline_mode = #tpu.pipeline_mode<synchronous>, transform_indices = @transform_9, window_bounds = array<i64: 64, 32>}, {pipeline_mode = #tpu.pipeline_mode<synchronous>, transform_indices = @transform_10, window_bounds = array<i64: 1, 32>}, {pipeline_mode = #tpu.pipeline_mode<synchronous>, transform_indices = @transform_11, window_bounds = array<i64: 32, 128>}, {pipeline_mode = #tpu.pipeline_mode<synchronous>, transform_indices = @transform_12, window_bounds = array<i64: 1, 128>}, {transform_indices = @transform_13, window_bounds = array<i64: 8, 128>}]} {
    %c0 = arith.constant 0 : index
    %c0_0 = arith.constant 0 : index
    %0 = vector.load %arg1[%c0, %c0_0] : memref<8x128xbf16, #tpu.memory_space<vmem>>, vector<8x128xbf16>
    %c0_1 = arith.constant 0 : index
    %c0_2 = arith.constant 0 : index
    %1 = vector.load %arg2[%c0_1, %c0_2] : memref<128x512xbf16, #tpu.memory_space<vmem>>, vector<128x512xbf16>
    %cst = arith.constant dense<0.000000e+00> : vector<8x512xf32>
    %2 = tpu.matmul %0, %1, %cst {dimension_numbers = #tpu.dot_dimension_numbers<[1], [0], [0], [1], [0, 0, 1, 1], [], []>} : vector<8x128xbf16>, vector<128x512xbf16>, vector<8x512xf32> -> vector<8x512xf32>
    %c0_3 = arith.constant 0 : index
    %c0_4 = arith.constant 0 : index
    %3 = vector.load %arg3[%c0_3, %c0_4] : memref<1x512xf32, #tpu.memory_space<vmem>>, vector<1x512xf32>
    %4 = vector.broadcast %3 : vector<1x512xf32> to vector<8x512xf32>
    %5 = arith.addf %2, %4 : vector<8x512xf32>
    %cst_5 = arith.constant 0.000000e+00 : f32
    %6 = vector.broadcast %cst_5 : f32 to vector<8x512xf32>
    %7 = arith.maximumf %5, %6 : vector<8x512xf32>
    %8 = arith.truncf %7 : vector<8x512xf32> to vector<8x512xbf16>
    %c0_6 = arith.constant 0 : index
    %c0_7 = arith.constant 0 : index
    %9 = vector.load %arg4[%c0_6, %c0_7] : memref<512x256xbf16, #tpu.memory_space<vmem>>, vector<512x256xbf16>
    %cst_8 = arith.constant dense<0.000000e+00> : vector<8x256xf32>
    %10 = tpu.matmul %8, %9, %cst_8 {dimension_numbers = #tpu.dot_dimension_numbers<[1], [0], [0], [1], [0, 0, 1, 1], [], []>} : vector<8x512xbf16>, vector<512x256xbf16>, vector<8x256xf32> -> vector<8x256xf32>
    %c0_9 = arith.constant 0 : index
    %c0_10 = arith.constant 0 : index
    %11 = vector.load %arg5[%c0_9, %c0_10] : memref<1x256xf32, #tpu.memory_space<vmem>>, vector<1x256xf32>
    %12 = vector.broadcast %11 : vector<1x256xf32> to vector<8x256xf32>
    %13 = arith.addf %10, %12 : vector<8x256xf32>
    %cst_11 = arith.constant 0.000000e+00 : f32
    %14 = vector.broadcast %cst_11 : f32 to vector<8x256xf32>
    %15 = arith.maximumf %13, %14 : vector<8x256xf32>
    %16 = arith.truncf %15 : vector<8x256xf32> to vector<8x256xbf16>
    %c0_12 = arith.constant 0 : index
    %c0_13 = arith.constant 0 : index
    %17 = vector.load %arg6[%c0_12, %c0_13] : memref<256x128xbf16, #tpu.memory_space<vmem>>, vector<256x128xbf16>
    %cst_14 = arith.constant dense<0.000000e+00> : vector<8x128xf32>
    %18 = tpu.matmul %16, %17, %cst_14 {dimension_numbers = #tpu.dot_dimension_numbers<[1], [0], [0], [1], [0, 0, 1, 1], [], []>} : vector<8x256xbf16>, vector<256x128xbf16>, vector<8x128xf32> -> vector<8x128xf32>
    %c0_15 = arith.constant 0 : index
    %c0_16 = arith.constant 0 : index
    %19 = vector.load %arg7[%c0_15, %c0_16] : memref<1x128xf32, #tpu.memory_space<vmem>>, vector<1x128xf32>
    %20 = vector.broadcast %19 : vector<1x128xf32> to vector<8x128xf32>
    %21 = arith.addf %18, %20 : vector<8x128xf32>
    %cst_17 = arith.constant 0.000000e+00 : f32
    %22 = vector.broadcast %cst_17 : f32 to vector<8x128xf32>
    %23 = arith.maximumf %21, %22 : vector<8x128xf32>
    %24 = arith.truncf %23 : vector<8x128xf32> to vector<8x128xbf16>
    %c0_18 = arith.constant 0 : index
    %c0_19 = arith.constant 0 : index
    %25 = vector.load %arg8[%c0_18, %c0_19] : memref<128x64xbf16, #tpu.memory_space<vmem>>, vector<128x64xbf16>
    %cst_20 = arith.constant dense<0.000000e+00> : vector<8x64xf32>
    %26 = tpu.matmul %24, %25, %cst_20 {dimension_numbers = #tpu.dot_dimension_numbers<[1], [0], [0], [1], [0, 0, 1, 1], [], []>} : vector<8x128xbf16>, vector<128x64xbf16>, vector<8x64xf32> -> vector<8x64xf32>
    %c0_21 = arith.constant 0 : index
    %c0_22 = arith.constant 0 : index
    %27 = vector.load %arg9[%c0_21, %c0_22] : memref<1x64xf32, #tpu.memory_space<vmem>>, vector<1x64xf32>
    %28 = vector.broadcast %27 : vector<1x64xf32> to vector<8x64xf32>
    %29 = arith.addf %26, %28 : vector<8x64xf32>
    %cst_23 = arith.constant 0.000000e+00 : f32
    %30 = vector.broadcast %cst_23 : f32 to vector<8x64xf32>
    %31 = arith.maximumf %29, %30 : vector<8x64xf32>
    %32 = arith.truncf %31 : vector<8x64xf32> to vector<8x64xbf16>
    %c0_24 = arith.constant 0 : index
    %c0_25 = arith.constant 0 : index
    %33 = vector.load %arg10[%c0_24, %c0_25] : memref<64x32xbf16, #tpu.memory_space<vmem>>, vector<64x32xbf16>
    %cst_26 = arith.constant dense<0.000000e+00> : vector<8x32xf32>
    %34 = tpu.matmul %32, %33, %cst_26 {dimension_numbers = #tpu.dot_dimension_numbers<[1], [0], [0], [1], [0, 0, 1, 1], [], []>} : vector<8x64xbf16>, vector<64x32xbf16>, vector<8x32xf32> -> vector<8x32xf32>
    %c0_27 = arith.constant 0 : index
    %c0_28 = arith.constant 0 : index
    %35 = vector.load %arg11[%c0_27, %c0_28] : memref<1x32xf32, #tpu.memory_space<vmem>>, vector<1x32xf32>
    %36 = vector.broadcast %35 : vector<1x32xf32> to vector<8x32xf32>
    %37 = arith.addf %34, %36 : vector<8x32xf32>
    %cst_29 = arith.constant 0.000000e+00 : f32
    %38 = vector.broadcast %cst_29 : f32 to vector<8x32xf32>
    %39 = arith.maximumf %37, %38 : vector<8x32xf32>
    %40 = arith.truncf %39 : vector<8x32xf32> to vector<8x32xbf16>
    %c0_30 = arith.constant 0 : index
    %c0_31 = arith.constant 0 : index
    %41 = vector.load %arg12[%c0_30, %c0_31] : memref<32x128xbf16, #tpu.memory_space<vmem>>, vector<32x128xbf16>
    %cst_32 = arith.constant dense<0.000000e+00> : vector<8x128xf32>
    %42 = tpu.matmul %40, %41, %cst_32 {dimension_numbers = #tpu.dot_dimension_numbers<[1], [0], [0], [1], [0, 0, 1, 1], [], []>} : vector<8x32xbf16>, vector<32x128xbf16>, vector<8x128xf32> -> vector<8x128xf32>
    %c0_33 = arith.constant 0 : index
    %c0_34 = arith.constant 0 : index
    %43 = vector.load %arg13[%c0_33, %c0_34] : memref<1x128xf32, #tpu.memory_space<vmem>>, vector<1x128xf32>
    %44 = vector.broadcast %43 : vector<1x128xf32> to vector<8x128xf32>
    %45 = arith.addf %42, %44 : vector<8x128xf32>
    %cst_35 = arith.constant dense<0xFF800000> : vector<8xf32>
    %46 = vector.multi_reduction <maximumf>, %45, %cst_35 [1] : vector<8x128xf32> to vector<8xf32>
    %47 = vector.shape_cast %46 : vector<8xf32> to vector<8x1xf32>
    %48 = vector.broadcast %47 : vector<8x1xf32> to vector<8x128xf32>
    %49 = arith.subf %45, %48 : vector<8x128xf32>
    %50 = math.exp %49 : vector<8x128xf32>
    %cst_36 = arith.constant dense<0.000000e+00> : vector<8xf32>
    %51 = vector.multi_reduction <add>, %50, %cst_36 [1] : vector<8x128xf32> to vector<8xf32>
    %52 = vector.shape_cast %51 : vector<8xf32> to vector<8x1xf32>
    %53 = tpu.reciprocal %52 {approx = true} : vector<8x1xf32> -> vector<8x1xf32>
    %54 = vector.broadcast %53 : vector<8x1xf32> to vector<8x128xf32>
    %55 = arith.mulf %50, %54 : vector<8x128xf32>
    %c0_37 = arith.constant 0 : index
    %c0_38 = arith.constant 0 : index
    %56 = vector.load %arg14[%c0_37, %c0_38] : memref<8x128xf32, #tpu.memory_space<vmem>>, vector<8x128xf32>
    tpu.vector_store %arg14[%c0_37, %c0_38], %55 {strides = array<i32>} : memref<8x128xf32, #tpu.memory_space<vmem>>, vector<8x128xf32>,
    return
  }
  func.func @transform_0(%arg0: i32) -> (i32, i32) {
    %c0_i32 = arith.constant 0 : i32
    %c0_i32_0 = arith.constant 0 : i32
    return %arg0, %c0_i32 : i32, i32
  }
  func.func @transform_1(%arg0: i32) -> (i32, i32) {
    %c0_i32 = arith.constant 0 : i32
    %c0_i32_0 = arith.constant 0 : i32
    %c0_i32_1 = arith.constant 0 : i32
    return %c0_i32, %c0_i32_0 : i32, i32
  }
  func.func @transform_2(%arg0: i32) -> (i32, i32) {
    %c0_i32 = arith.constant 0 : i32
    %c0_i32_0 = arith.constant 0 : i32
    %c0_i32_1 = arith.constant 0 : i32
    return %c0_i32, %c0_i32_0 : i32, i32
  }
  func.func @transform_3(%arg0: i32) -> (i32, i32) {
    %c0_i32 = arith.constant 0 : i32
    %c0_i32_0 = arith.constant 0 : i32
    %c0_i32_1 = arith.constant 0 : i32
    return %c0_i32, %c0_i32_0 : i32, i32
  }
  func.func @transform_4(%arg0: i32) -> (i32, i32) {
    %c0_i32 = arith.constant 0 : i32
    %c0_i32_0 = arith.constant 0 : i32
    %c0_i32_1 = arith.constant 0 : i32
    return %c0_i32, %c0_i32_0 : i32, i32
  }
  func.func @transform_5(%arg0: i32) -> (i32, i32) {
    %c0_i32 = arith.constant 0 : i32
    %c0_i32_0 = arith.constant 0 : i32
    %c0_i32_1 = arith.constant 0 : i32
    return %c0_i32, %c0_i32_0 : i32, i32
  }
  func.func @transform_6(%arg0: i32) -> (i32, i32) {
    %c0_i32 = arith.constant 0 : i32
    %c0_i32_0 = arith.constant 0 : i32
    %c0_i32_1 = arith.constant 0 : i32
    return %c0_i32, %c0_i32_0 : i32, i32
  }
  func.func @transform_7(%arg0: i32) -> (i32, i32) {
    %c0_i32 = arith.constant 0 : i32
    %c0_i32_0 = arith.constant 0 : i32
    %c0_i32_1 = arith.constant 0 : i32
    return %c0_i32, %c0_i32_0 : i32, i32
  }
  func.func @transform_8(%arg0: i32) -> (i32, i32) {
    %c0_i32 = arith.constant 0 : i32
    %c0_i32_0 = arith.constant 0 : i32
    %c0_i32_1 = arith.constant 0 : i32
    return %c0_i32, %c0_i32_0 : i32, i32
  }
  func.func @transform_9(%arg0: i32) -> (i32, i32) {
    %c0_i32 = arith.constant 0 : i32
    %c0_i32_0 = arith.constant 0 : i32
    %c0_i32_1 = arith.constant 0 : i32
    return %c0_i32, %c0_i32_0 : i32, i32
  }
  func.func @transform_10(%arg0: i32) -> (i32, i32) {
    %c0_i32 = arith.constant 0 : i32
    %c0_i32_0 = arith.constant 0 : i32
    %c0_i32_1 = arith.constant 0 : i32
    return %c0_i32, %c0_i32_0 : i32, i32
  }
  func.func @transform_11(%arg0: i32) -> (i32, i32) {
    %c0_i32 = arith.constant 0 : i32
    %c0_i32_0 = arith.constant 0 : i32
    %c0_i32_1 = arith.constant 0 : i32
    return %c0_i32, %c0_i32_0 : i32, i32
  }
  func.func @transform_12(%arg0: i32) -> (i32, i32) {
    %c0_i32 = arith.constant 0 : i32
    %c0_i32_0 = arith.constant 0 : i32
    %c0_i32_1 = arith.constant 0 : i32
    return %c0_i32, %c0_i32_0 : i32, i32
  }
  func.func @transform_13(%arg0: i32) -> (i32, i32) {
    %c0_i32 = arith.constant 0 : i32
    %c0_i32_0 = arith.constant 0 : i32
    return %arg0, %c0_i32 : i32, i32
  }
}

</mosaic_0001>

<bundles_post_ra>
// kernel: tpu_custom_call.1
= control target key start
LH: loop header
LB: loop body
LE: loop exit
PB: predicated region body
PF: predicated region fallthrough
CT: control target
= control target key end

     0   :  { %18 = vsyncpa [#allocation3], 0  ;;  %s2261_s0 = inlined_call_operand.hbm [shape: bf16[8,128], index: 0, kind: input, shape index: {}]   ;;  %s2262_s1 = inlined_call_operand.hbm [shape: bf16[128,512], index: 1, kind: input, shape index: {}]   ;;  %s2263_s2 = inlined_call_operand.hbm [shape: f32[1,512], index: 2, kind: input, shape index: {}]   ;;  %s2264_s3 = inlined_call_operand.hbm [shape: bf16[512,256], index: 3, kind: input, shape index: {}]   ;;  %s2265_s4 = inlined_call_operand.vmem [shape: f32[1,256], index: 4, kind: input, shape index: {}]   ;;  %s2266_s5 = inlined_call_operand.vmem [shape: bf16[256,128], index: 5, kind: input, shape index: {}]   ;;  %s2267_s6 = inlined_call_operand.hbm [shape: f32[1,128], index: 6, kind: input, shape index: {}]   ;;  %s2268_s7 = inlined_call_operand.vmem [shape: bf16[128,64], index: 7, kind: input, shape index: {}]   ;;  %s2269_s8 = inlined_call_operand.hbm [shape: f32[1,64], index: 8, kind: input, shape index: {}]   ;;  %s2270_s9 = inlined_call_operand.vmem [shape: bf16[64,32], index: 9, kind: input, shape index: {}]   ;;  %s2271_s10 = inlined_call_operand.vmem [shape: f32[1,32], index: 10, kind: input, shape index: {}]   ;;  %s2272_s11 = inlined_call_operand.vmem [shape: bf16[32,128], index: 11, kind: input, shape index: {}]   ;;  %s2273_s12 = inlined_call_operand.vmem [shape: f32[1,128], index: 12, kind: input, shape index: {}]   ;;  %s2274_s13 = inlined_call_operand.hbm [shape: f32[8,128], index: 13, kind: output, shape index: {}]  }
   0x1   :  { %19 = vsyncpa [#allocation6], 0 }
   0x2   :  { %20 = vsyncpa [#allocation9], 0 }
   0x3   :  { %21 = vsyncpa [#allocation12], 0 }
   0x4   :  { %22 = vsyncpa [#allocation4], 0  ;;  %s1950_s25 = smov [#allocation5]   ;;  %s1786_s29 = scalar_lea.hbm %s2262_s1, 4096 }
   0x5   :  { %s38_s26 = sshll.u32 %s1950_s25, 4  ;;  %p1787_p0 = scmp.ne.s32.totalorder %s2262_s1, %s1786_s29  ;;  %s39_s26 = int_to_ptr.vmem [resolvable:$true] %s38_s26 }
   0x6   :  { %p1790_p1 = scmp.lt.u32.totalorder %s1786_s29, %s2262_s1 }
   0x8   :  { %p1792_p2 = pnand %p1790_p1, %p1787_p0 }
   0xa   :  { %1795 = shalt.err (!%p1792_p2)
}
   0xb   :  { %s1796_s17 = scalar_lea.vmem %s39_s26, 4096  ;;  %p1801_p4 = scmp.lt.s32.totalorder %s39_s26, %s39_s26 }
   0xc   :  { %p1797_p3 = scmp.ne.s32.totalorder %s39_s26, %s1796_s17  ;;  %p1802_p5 = scmp.lt.s32.totalorder %s1796_s17, %s1796_s17 }
   0xe   :  { %p1803_p6 = por %p1802_p5, %p1801_p4 }
  0x10   :  { %p1804_p7 = pnand %p1803_p6, %p1797_p3 }
  0x12   :  { %1807 = shalt.err (!%p1804_p7)
}
  0x13   :  { %s1951_s18 = smov 256   ;;  %s1952_s19 = smov 16  }
  0x14   :  { %44 = dma.hbm_to_vmem [thread:$0]  %s2262_s1, 4096, %s39_s26, [#allocation6], %s1951_s18, %s1951_s18, %s1952_s19  }
  0x15   :  { %s1953_s22 = smov [#allocation8]   ;;  %s1808_s27 = scalar_lea.hbm %s2264_s3, 8192 }
  0x16   :  { %s60_s23 = sshll.u32 %s1953_s22, 4  ;;  %p1809_p8 = scmp.ne.s32.totalorder %s2264_s3, %s1808_s27  ;;  %s61_s23 = int_to_ptr.vmem [resolvable:$true] %s60_s23 }
  0x17   :  { %p1812_p9 = scmp.lt.u32.totalorder %s1808_s27, %s2264_s3 }
  0x19   :  { %p1814_p10 = pnand %p1812_p9, %p1809_p8 }
  0x1b   :  { %1817 = shalt.err (!%p1814_p10)
}
  0x1c   :  { %s1818_s15 = scalar_lea.vmem %s61_s23, 8192  ;;  %p1823_p12 = scmp.lt.s32.totalorder %s61_s23, %s61_s23 }
  0x1d   :  { %p1819_p11 = scmp.ne.s32.totalorder %s61_s23, %s1818_s15  ;;  %p1824_p13 = scmp.lt.s32.totalorder %s1818_s15, %s1818_s15 }
  0x1f   :  { %p1825_p0 = por %p1824_p13, %p1823_p12 }
  0x21   :  { %p1826_p1 = pnand %p1825_p0, %p1819_p11 }
  0x23   :  { %1829 = shalt.err (!%p1826_p1)
}
  0x24   :  { %s1954_s1 = smov 128   ;;  %s1955_s26 = smov 8  }
  0x25   :  { %66 = dma.hbm_to_vmem [thread:$0]  %s2264_s3, 8192, %s61_s23, [#allocation9], %s1954_s1, %s1954_s1, %s1955_s26  }
  0x26   :  { %s1956_s18 = smov [#allocation2]   ;;  %s1957_s20 = smov [#allocation7]  }
  0x27   :  { %s29_s19 = sshll.u32 %s1956_s18, 4  ;;  %s51_s21 = sshll.u32 %s1957_s20, 4  ;;  %s30_s19 = int_to_ptr.vmem [resolvable:$true] %s29_s19  ;;  %s52_s21 = int_to_ptr.vmem [resolvable:$true] %s51_s21 }
  0x28   :  { %s1830_s25 = scalar_lea.hbm %s2261_s0, 64 }
  0x29   :  { %p1831_p2 = scmp.ne.s32.totalorder %s2261_s0, %s1830_s25  ;;  %p1834_p3 = scmp.lt.u32.totalorder %s1830_s25, %s2261_s0 }
  0x2b   :  { %p1836_p4 = pnand %p1834_p3, %p1831_p2 }
  0x2d   :  { %1839 = shalt.err (!%p1836_p4)
}
  0x2e   :  { %s1840_s3 = scalar_lea.vmem %s30_s19, 64  ;;  %p1845_p6 = scmp.lt.s32.totalorder %s30_s19, %s30_s19 }
  0x2f   :  { %p1841_p5 = scmp.ne.s32.totalorder %s30_s19, %s1840_s3  ;;  %p1846_p7 = scmp.lt.s32.totalorder %s1840_s3, %s1840_s3 }
  0x31   :  { %p1847_p8 = por %p1846_p7, %p1845_p6 }
  0x33   :  { %p1848_p9 = pnand %p1847_p8, %p1841_p5 }
  0x35   :  { %1851 = shalt.err (!%p1848_p9)
}
  0x36   :  { %32 = dma.hbm_to_vmem [thread:$0]  %s2261_s0, 64, %s30_s19, [#allocation3]  }
  0x37   :  { %s1852_s26 = scalar_lea.hbm %s2263_s2, 64 }
  0x38   :  { %p1853_p10 = scmp.ne.s32.totalorder %s2263_s2, %s1852_s26  ;;  %p1856_p11 = scmp.lt.u32.totalorder %s1852_s26, %s2263_s2 }
  0x3a   :  { %p1858_p12 = pnand %p1856_p11, %p1853_p10 }
  0x3c   :  { %1861 = shalt.err (!%p1858_p12)
}
  0x3d   :  { %s1862_s22 = scalar_lea.vmem %s52_s21, 64  ;;  %p1867_p0 = scmp.lt.s32.totalorder %s52_s21, %s52_s21 }
  0x3e   :  { %p1863_p13 = scmp.ne.s32.totalorder %s52_s21, %s1862_s22  ;;  %p1868_p1 = scmp.lt.s32.totalorder %s1862_s22, %s1862_s22 }
  0x40   :  { %p1869_p2 = por %p1868_p1, %p1867_p0 }
  0x42   :  { %p1870_p3 = pnand %p1869_p2, %p1863_p13 }
  0x44   :  { %1873 = shalt.err (!%p1870_p3)
}
  0x45   :  { %54 = dma.hbm_to_vmem [thread:$0]  %s2263_s2, 64, %s52_s21, [#allocation6]  }
  0x46   :  { %s1958_s24 = smov [#allocation10]   ;;  %s1959_s27 = smov [#allocation11]  }
  0x47   :  { %s77_s25 = sshll.u32 %s1958_s24, 4  ;;  %s89_s28 = sshll.u32 %s1959_s27, 4  ;;  %s78_s25 = int_to_ptr.vmem [resolvable:$true] %s77_s25  ;;  %s90_s28 = int_to_ptr.vmem [resolvable:$true] %s89_s28 }
  0x48   :  { %s1874_s3 = scalar_lea.hbm %s2267_s6, 16 }
  0x49   :  { %p1875_p4 = scmp.ne.s32.totalorder %s2267_s6, %s1874_s3  ;;  %p1878_p5 = scmp.lt.u32.totalorder %s1874_s3, %s2267_s6 }
  0x4b   :  { %p1880_p6 = pnand %p1878_p5, %p1875_p4 }
  0x4d   :  { %1883 = shalt.err (!%p1880_p6)
}
  0x4e   :  { %s1884_s2 = scalar_lea.vmem %s78_s25, 16  ;;  %s1888_s21 = scalar_lea.vmem %s78_s25, 32 }
  0x4f   :  { %p1885_p7 = scmp.ne.s32.totalorder %s78_s25, %s1884_s2  ;;  %p1889_p8 = scmp.lt.s32.totalorder %s78_s25, %s78_s25 }
  0x50   :  { %p1890_p9 = scmp.lt.s32.totalorder %s1888_s21, %s1884_s2 }
  0x52   :  { %p1891_p10 = por %p1890_p9, %p1889_p8 }
  0x54   :  { %p1892_p11 = pnand %p1891_p10, %p1885_p7 }
  0x56   :  { %1895 = shalt.err (!%p1892_p11)
}
  0x57   :  { %80 = dma.hbm_to_vmem [thread:$0]  %s2267_s6, 16, %s78_s25, [#allocation9]  }
  0x58   :  { %s1896_s20 = scalar_lea.hbm %s2269_s8, 16 }
  0x59   :  { %p1897_p12 = scmp.ne.s32.totalorder %s2269_s8, %s1896_s20  ;;  %p1900_p13 = scmp.lt.u32.totalorder %s1896_s20, %s2269_s8 }
  0x5b   :  { %p1902_p0 = pnand %p1900_p13, %p1897_p12 }
  0x5d   :  { %1905 = shalt.err (!%p1902_p0)
}
  0x5e   :  { %s1906_s27 = scalar_lea.vmem %s90_s28, 16  ;;  %s1910_s29 = scalar_lea.vmem %s90_s28, 32 }
  0x5f   :  { %p1907_p1 = scmp.ne.s32.totalorder %s90_s28, %s1906_s27  ;;  %p1911_p2 = scmp.lt.s32.totalorder %s90_s28, %s90_s28 }
  0x60   :  { %p1912_p3 = scmp.lt.s32.totalorder %s1910_s29, %s1906_s27 }
  0x62   :  { %p1913_p4 = por %p1912_p3, %p1911_p2 }
  0x64   :  { %p1914_p5 = pnand %p1913_p4, %p1907_p1 }
  0x66   :  { %1917 = shalt.err (!%p1914_p5)
}
  0x67   :  { %92 = dma.hbm_to_vmem [thread:$0]  %s2269_s8, 16, %s90_s28, [#allocation12]  }
  0x68   :  { %1940 = dma.done.wait [#allocation3], 64  }
  0x69   :  { %1941 = vsyncadd [#allocation3], 4294967232 }
  0x6a   :  { %1942 = dma.done.wait [#allocation6], 4160  }
  0x6b   :  { %1943 = vsyncadd [#allocation6], 4294963136 }
  0x6c   :  { %1944 = dma.done.wait [#allocation9], 8208  }
  0x6d   :  { %1945 = vsyncadd [#allocation9], 4294959088 }
  0x6e   :  { %1946 = dma.done.wait [#allocation12], 16  }
  0x6f   :  { %1947 = vsyncadd [#allocation12], 4294967280  ;;  %v1960_v0 = vmov 0   ;;  %v1608_v1 = vld [vmem:[#allocation5 + $0x4] ss:$16 sps:$4 sm:$0xff]   ;;  %vm1962_vm0 = vmmov 0  }
  0x70   :  { %367 = vmatprep.mubr.bf16.mxu1 %v1960_v0  ;;  %v1610_v2 = vld [vmem:[#allocation5] ss:$16 sps:$4 sm:$0xff]   ;;  %335 = vmatprep.subr.bf16.mxu1 %v1608_v1  ;;  %v1611_v3 = vld [vmem:[#allocation5 + $0x24] ss:$16 sps:$4 sm:$0xff]   ;;  %v1634_v22 = vld [vmem:[#allocation5 + $0xc] ss:$16 sps:$4 sm:$0xff]  }
  0x71   :  { %336 = vmatpush1.bf16.msra.mxu1 %v1610_v2  ;;  %v1613_v4 = vld [vmem:[#allocation5 + $0x20] ss:$16 sps:$4 sm:$0xff]   ;;  %v1614_v5 = vld [vmem:[#allocation5 + $0x44] ss:$16 sps:$4 sm:$0xff]   ;;  %v2106_v24 = vld [vmem:[#allocation2] sm:$0xf] }
  0x72   :  { %337 = vmatprep.subr.bf16.mxu1 %v1611_v3  ;;  %v1616_v6 = vld [vmem:[#allocation5 + $0x40] ss:$16 sps:$4 sm:$0xff]   ;;  %v1617_v7 = vld [vmem:[#allocation5 + $0x64] ss:$16 sps:$4 sm:$0xff]   ;;  %v1632_v26 = vld [vmem:[#allocation5 + $0x8] ss:$16 sps:$4 sm:$0xff]  }
  0x73   :  { %v1619_v8 = vld [vmem:[#allocation5 + $0x60] ss:$16 sps:$4 sm:$0xff]   ;;  %v1620_v9 = vld [vmem:[#allocation5 + $0x84] ss:$16 sps:$4 sm:$0xff]   ;;  %v1637_v27 = vld [vmem:[#allocation5 + $0x2c] ss:$16 sps:$4 sm:$0xff]  }
  0x74   :  { %v1622_v10 = vld [vmem:[#allocation5 + $0x80] ss:$16 sps:$4 sm:$0xff]   ;;  %v1623_v11 = vld [vmem:[#allocation5 + $0xa4] ss:$16 sps:$4 sm:$0xff]   ;;  %v1635_v30 = vld [vmem:[#allocation5 + $0x28] ss:$16 sps:$4 sm:$0xff]  }
  0x75   :  { %338 = vmatpush1.bf16.msra.mxu1 %v1613_v4  ;;  %v1625_v12 = vld [vmem:[#allocation5 + $0xa0] ss:$16 sps:$4 sm:$0xff]   ;;  %v1626_v13 = vld [vmem:[#allocation5 + $0xc4] ss:$16 sps:$4 sm:$0xff]   ;;  %v1640_v31 = vld [vmem:[#allocation5 + $0x4c] ss:$16 sps:$4 sm:$0xff]  }
  0x76   :  { %339 = vmatprep.subr.bf16.mxu1 %v1614_v5  ;;  %v1628_v14 = vld [vmem:[#allocation5 + $0xc0] ss:$16 sps:$4 sm:$0xff]   ;;  %v1658_v16 = vld [vmem:[#allocation8] ss:$8 sps:$4 sm:$0xff]   ;;  %v1661_v19 = vld [vmem:[#allocation8 + $0x10] ss:$8 sps:$4 sm:$0xff]  }
  0x77   :  { %v1656_v15 = vld [vmem:[#allocation8 + $0x4] ss:$8 sps:$4 sm:$0xff]   ;;  %v1659_v17 = vld [vmem:[#allocation8 + $0x14] ss:$8 sps:$4 sm:$0xff]   ;;  %v1629_v18 = vld [vmem:[#allocation5 + $0xe4] ss:$16 sps:$4 sm:$0xff]  }
  0x78   :  { %821 = vmatprep.subr.bf16.mxu0 %v1656_v15  ;;  %v1662_v20 = vld [vmem:[#allocation8 + $0x24] ss:$8 sps:$4 sm:$0xff]   ;;  %v1664_v23 = vld [vmem:[#allocation8 + $0x20] ss:$8 sps:$4 sm:$0xff]   ;;  %v1665_v25 = vld [vmem:[#allocation8 + $0x34] ss:$8 sps:$4 sm:$0xff]   ;;  %v155_v15 = vlaneseq }
  0x79   :  { %340 = vmatpush1.bf16.msra.mxu1 %v1616_v6  ;;  %822 = vmatpush1.bf16.msra.mxu0 %v1658_v16  ;;  %v1631_v21 = vld [vmem:[#allocation5 + $0xe0] ss:$16 sps:$4 sm:$0xff]   ;;  %v1667_v28 = vld [vmem:[#allocation8 + $0x30] ss:$8 sps:$4 sm:$0xff]   ;;  %v1670_v32 = vld [vmem:[#allocation8 + $0x40] ss:$8 sps:$4 sm:$0xff]  }
  0x7a   :  { %341 = vmatprep.subr.bf16.mxu1 %v1617_v7  ;;  %823 = vmatprep.subr.bf16.mxu0 %v1659_v17  ;;  %v1668_v29 = vld [vmem:[#allocation8 + $0x44] ss:$8 sps:$4 sm:$0xff]   ;;  %v1671_v34 = vld [vmem:[#allocation8 + $0x54] ss:$8 sps:$4 sm:$0xff]   ;;  %v1643_v35 = vld [vmem:[#allocation5 + $0x6c] ss:$16 sps:$4 sm:$0xff]  }
  0x7b   :  { %v1638_v33 = vld [vmem:[#allocation5 + $0x48] ss:$16 sps:$4 sm:$0xff]   ;;  %v1673_v36 = vld [vmem:[#allocation8 + $0x50] ss:$8 sps:$4 sm:$0xff]   ;;  %v1676_v40 = vld [vmem:[#allocation8 + $0x60] ss:$8 sps:$4 sm:$0xff]  }
  0x7c   :  { %v1674_v37 = vld [vmem:[#allocation8 + $0x64] ss:$8 sps:$4 sm:$0xff]   ;;  %v1646_v39 = vld [vmem:[#allocation5 + $0x8c] ss:$16 sps:$4 sm:$0xff]   ;;  %v1677_v41 = vld [vmem:[#allocation8 + $0x74] ss:$8 sps:$4 sm:$0xff]  }
  0x7d   :  { %342 = vmatpush1.bf16.msra.mxu1 %v1619_v8  ;;  %824 = vmatpush1.bf16.msra.mxu0 %v1661_v19  ;;  %v1641_v38 = vld [vmem:[#allocation5 + $0x68] ss:$16 sps:$4 sm:$0xff]   ;;  %v1649_v43 = vld [vmem:[#allocation5 + $0xac] ss:$16 sps:$4 sm:$0xff]   ;;  %v2146_v16 = vshrl.u32 %v155_v15, 7  ;;  %vm1236_vm1 = vcmask 523264  }
  0x7e   :  { %343 = vmatprep.subr.bf16.mxu1 %v1620_v9  ;;  %825 = vmatprep.subr.bf16.mxu0 %v1662_v20  ;;  %v1644_v42 = vld [vmem:[#allocation5 + $0x88] ss:$16 sps:$4 sm:$0xff]   ;;  %v1679_v44 = vld [vmem:[#allocation8 + $0x70] ss:$8 sps:$4 sm:$0xff]   ;;  %v1682_v48 = vld [vmem:[#allocation8 + $0x80] ss:$8 sps:$4 sm:$0xff]  }
  0x7f   :  { %v1680_v45 = vld [vmem:[#allocation8 + $0x84] ss:$8 sps:$4 sm:$0xff]   ;;  %v1652_v47 = vld [vmem:[#allocation5 + $0xcc] ss:$16 sps:$4 sm:$0xff]   ;;  %v1683_v49 = vld [vmem:[#allocation8 + $0x94] ss:$8 sps:$4 sm:$0xff]  }
  0x80   :  { %v1647_v46 = vld [vmem:[#allocation5 + $0xa8] ss:$16 sps:$4 sm:$0xff]   ;;  %v1655_v51 = vld [vmem:[#allocation5 + $0xec] ss:$16 sps:$4 sm:$0xff]   ;;  %v157_v17 = vsub.s32 0, %v2146_v16  ;;  %v161_v19 = vsub.s32 1, %v2146_v16 }
  0x81   :  { %344 = vmatpush1.bf16.msra.mxu1 %v1622_v10  ;;  %826 = vmatpush1.bf16.msra.mxu0 %v1664_v23  ;;  %v1650_v50 = vld [vmem:[#allocation5 + $0xc8] ss:$16 sps:$4 sm:$0xff]   ;;  %v1685_v52 = vld [vmem:[#allocation8 + $0x90] ss:$8 sps:$4 sm:$0xff]   ;;  %v1688_v55 = vld [vmem:[#allocation8 + $0xa0] ss:$8 sps:$4 sm:$0xff]  }
  0x82   :  { %345 = vmatprep.subr.bf16.mxu1 %v1623_v11  ;;  %827 = vmatprep.subr.bf16.mxu0 %v1665_v25  ;;  %v1686_v53 = vld [vmem:[#allocation8 + $0xa4] ss:$8 sps:$4 sm:$0xff]   ;;  %v1689_v56 = vld [vmem:[#allocation8 + $0xb4] ss:$8 sps:$4 sm:$0xff]   ;;  %v1691_v57 = vld [vmem:[#allocation8 + $0xb0] ss:$8 sps:$4 sm:$0xff]  }
  0x83   :  { %v1653_v54 = vld [vmem:[#allocation5 + $0xe8] ss:$16 sps:$4 sm:$0xff]   ;;  %v1694_v59 = vld [vmem:[#allocation8 + $0xc0] ss:$8 sps:$4 sm:$0xff]   ;;  %v1697_v61 = vld [vmem:[#allocation8 + $0xd0] ss:$8 sps:$4 sm:$0xff]  }
  0x84   :  { %v1692_v58 = vld [vmem:[#allocation8 + $0xc4] ss:$8 sps:$4 sm:$0xff]   ;;  %v1695_v60 = vld [vmem:[#allocation8 + $0xd4] ss:$8 sps:$4 sm:$0xff]   ;;  %v1700_v63 = vld [vmem:[#allocation8 + $0xe0] ss:$8 sps:$4 sm:$0xff]  }
  0x85   :  { %346 = vmatpush1.bf16.msra.mxu1 %v1625_v12  ;;  %828 = vmatpush1.bf16.msra.mxu0 %v1667_v28  ;;  %v1698_v62 = vld [vmem:[#allocation8 + $0xe4] ss:$8 sps:$4 sm:$0xff]   ;;  %v1703_v1 = vld [vmem:[#allocation8 + $0xf0] ss:$8 sps:$4 sm:$0xff]   ;;  %vm1305_vm2 = vcmask 261120  }
  0x86   :  { %347 = vmatprep.subr.bf16.mxu1 %v1626_v13  ;;  %829 = vmatprep.subr.bf16.mxu0 %v1668_v29  ;;  %v1706_v2 = vld [vmem:[#allocation8 + $0x104] ss:$8 sps:$4 sm:$0xff]   ;;  %v1752_v3 = vld [vmem:[%s2266_s5 + $0x40] sm:$0xff]   ;;  %v1758_v9 = vld [vmem:[%s2266_s5 + $0x58] sm:$0xff]  }
  0x87   :  { %v1753_v4 = vld [vmem:[%s2266_s5] sm:$0xff]   ;;  %v1754_v5 = vld [vmem:[%s2266_s5 + $0x48] sm:$0xff]   ;;  %v1756_v7 = vld [vmem:[%s2266_s5 + $0x50] sm:$0xff]  }
  0x88   :  { %v1755_v6 = vld [vmem:[%s2266_s5 + $0x8] sm:$0xff]   ;;  %v1757_v8 = vld [vmem:[%s2266_s5 + $0x10] sm:$0xff]   ;;  %v1759_v10 = vld [vmem:[%s2266_s5 + $0x18] sm:$0xff]  }
  0x89   :  { %348 = vmatpush1.bf16.msra.mxu1 %v1628_v14  ;;  %830 = vmatpush1.bf16.msra.mxu0 %v1670_v32  ;;  %v1760_v11 = vld [vmem:[%s2266_s5 + $0x60] sm:$0xff]   ;;  %v1762_v13 = vld [vmem:[%s2266_s5 + $0x68] sm:$0xff]   ;;  %v1766_v15 = vld [vmem:[%s2266_s5 + $0x78] sm:$0xff]  }
  0x8a   :  { %349 = vmatprep.subr.bf16.mxu1 %v1629_v18  ;;  %831 = vmatprep.subr.bf16.mxu0 %v1671_v34  ;;  %v1761_v12 = vld [vmem:[%s2266_s5 + $0x20] sm:$0xff]   ;;  %v1763_v14 = vld [vmem:[%s2266_s5 + $0x28] sm:$0xff]  }
  0x8b   :  { %v2149_v18 = vld [vmem:[#allocation7] sm:$0xf]  ;;  %v1707_v34 = vld [vmem:[#allocation8 + $0x110] ss:$8 sps:$4 sm:$0xff]  }
  0x8c   :  { %v158_v20 = vrot.slane %v2149_v18, %v157_v17 }
  0x8d   :  { %350 = vmatpush1.bf16.msra.mxu1 %v1631_v21  ;;  %832 = vmatpush1.bf16.msra.mxu0 %v1673_v36  ;;  %v162_v21 = vrot.slane %v2149_v18, %v161_v19  ;;  %v1710_v36 = vld [vmem:[#allocation8 + $0x120] ss:$8 sps:$4 sm:$0xff]  }
  0x8e   :  { %376 = vmatprep.subr.bf16.mxu1 %v1634_v22  ;;  %833 = vmatprep.subr.bf16.mxu0 %v1674_v37  ;;  %v1715_v37 = vld [vmem:[#allocation8 + $0x134] ss:$8 sps:$4 sm:$0xff]  }
  0x90   :  { %368 = vmatmul.mubr.bf16.vlgmr.msra.gmra.mrb[0].mxu1 %v2106_v24 }
  0x91   :  { %377 = vmatpush1.bf16.msra.mxu1 %v1632_v26  ;;  %408 = vmatprep.mubr.bf16.mxu1 %v1960_v0  ;;  %v1701_v0 = vld [vmem:[#allocation8 + $0xf4] ss:$8 sps:$4 sm:$0xff]  }
  0x92   :  { %378 = vmatprep.subr.bf16.mxu1 %v1637_v27  ;;  %834 = vmatpush1.bf16.msra.mxu0 %v1676_v40  ;;  %v1716_v40 = vld [vmem:[#allocation8 + $0x140] ss:$8 sps:$4 sm:$0xff]  }
  0x93   :  { %835 = vmatprep.subr.bf16.mxu0 %v1677_v41  ;;  %v1721_v41 = vld [vmem:[#allocation8 + $0x154] ss:$8 sps:$4 sm:$0xff]  }
  0x95   :  { %379 = vmatpush1.bf16.msra.mxu1 %v1635_v30 }
  0x96   :  { %380 = vmatprep.subr.bf16.mxu1 %v1640_v31  ;;  %836 = vmatpush1.bf16.msra.mxu0 %v1679_v44  ;;  %v1704_v31 = vld [vmem:[#allocation8 + $0x100] ss:$8 sps:$4 sm:$0xff]   ;;  %v1724_v44 = vld [vmem:[#allocation8 + $0x164] ss:$8 sps:$4 sm:$0xff]  }
  0x97   :  { %837 = vmatprep.subr.bf16.mxu0 %v1680_v45  ;;  %v1722_v45 = vld [vmem:[#allocation8 + $0x160] ss:$8 sps:$4 sm:$0xff]  }
  0x99   :  { %381 = vmatpush1.bf16.msra.mxu1 %v1638_v33  ;;  %v1709_v33 = vld [vmem:[#allocation8 + $0x114] ss:$8 sps:$4 sm:$0xff]  }
  0x9a   :  { %382 = vmatprep.subr.bf16.mxu1 %v1643_v35  ;;  %838 = vmatpush1.bf16.msra.mxu0 %v1682_v48  ;;  %v1712_v35 = vld [vmem:[#allocation8 + $0x124] ss:$8 sps:$4 sm:$0xff]  }
  0x9b   :  { %839 = vmatprep.subr.bf16.mxu0 %v1683_v49 }
  0x9d   :  { %383 = vmatpush1.bf16.msra.mxu1 %v1641_v38  ;;  %v1713_v38 = vld [vmem:[#allocation8 + $0x130] ss:$8 sps:$4 sm:$0xff]  }
  0x9e   :  { %384 = vmatprep.subr.bf16.mxu1 %v1646_v39  ;;  %840 = vmatpush1.bf16.msra.mxu0 %v1685_v52  ;;  %v1718_v39 = vld [vmem:[#allocation8 + $0x144] ss:$8 sps:$4 sm:$0xff]  }
  0x9f   :  { %841 = vmatprep.subr.bf16.mxu0 %v1686_v53  ;;  %v1730_v53 = vld [vmem:[#allocation8 + $0x184] ss:$8 sps:$4 sm:$0xff]  }
  0xa1   :  { %385 = vmatpush1.bf16.msra.mxu1 %v1644_v42  ;;  %v1719_v42 = vld [vmem:[#allocation8 + $0x150] ss:$8 sps:$4 sm:$0xff]  }
  0xa2   :  { %386 = vmatprep.subr.bf16.mxu1 %v1649_v43  ;;  %842 = vmatpush1.bf16.msra.mxu0 %v1688_v55  ;;  %v169_v43 = vsub.s32 3, %v2146_v16 }
  0xa3   :  { %843 = vmatprep.subr.bf16.mxu0 %v1689_v56  ;;  %v1728_v56 = vld [vmem:[#allocation8 + $0x180] ss:$8 sps:$4 sm:$0xff]  }
  0xa5   :  { %387 = vmatpush1.bf16.msra.mxu1 %v1647_v46  ;;  %v170_v46 = vrot.slane %v2149_v18, %v169_v43 }
  0xa6   :  { %388 = vmatprep.subr.bf16.mxu1 %v1652_v47  ;;  %844 = vmatpush1.bf16.msra.mxu0 %v1691_v57  ;;  %v1727_v47 = vld [vmem:[#allocation8 + $0x174] ss:$8 sps:$4 sm:$0xff]  }
  0xa7   :  { %845 = vmatprep.subr.bf16.mxu0 %v1692_v58  ;;  %v1733_v58 = vld [vmem:[#allocation8 + $0x194] ss:$8 sps:$4 sm:$0xff]  }
  0xa9   :  { %389 = vmatpush1.bf16.msra.mxu1 %v1650_v50  ;;  %v1725_v50 = vld [vmem:[#allocation8 + $0x170] ss:$8 sps:$4 sm:$0xff]  }
  0xaa   :  { %390 = vmatprep.subr.bf16.mxu1 %v1655_v51  ;;  %846 = vmatpush1.bf16.msra.mxu0 %v1694_v59  ;;  %v1731_v59 = vld [vmem:[#allocation8 + $0x190] ss:$8 sps:$4 sm:$0xff]  }
  0xab   :  { %847 = vmatprep.subr.bf16.mxu0 %v1695_v60  ;;  %v1736_v60 = vld [vmem:[#allocation8 + $0x1a4] ss:$8 sps:$4 sm:$0xff]  }
  0xad   :  { %391 = vmatpush1.bf16.msra.mxu1 %v1653_v54 }
  0xae   :  { %848 = vmatpush1.bf16.msra.mxu0 %v1697_v61  ;;  %1509 = vmatprep.subr.bf16.mxu1 %v1752_v3  ;;  %v1734_v61 = vld [vmem:[#allocation8 + $0x1a0] ss:$8 sps:$4 sm:$0xff]   ;;  %v1745_v3 = vld [vmem:[#allocation8 + $0x1d4] ss:$8 sps:$4 sm:$0xff]  }
  0xaf   :  { %849 = vmatprep.subr.bf16.mxu0 %v1698_v62  ;;  %v1739_v62 = vld [vmem:[#allocation8 + $0x1b4] ss:$8 sps:$4 sm:$0xff]  }
  0xb0   :  { %409 = vmatmul.mubr.bf16.vlgmr.msra.gmra.mrb[4].mxu1 %v2106_v24 }
  0xb1   :  { %1510 = vmatpush3.bf16.msra.mxu1 %v1753_v4  ;;  %v1743_v4 = vld [vmem:[#allocation8 + $0x1d0] ss:$8 sps:$4 sm:$0xff]  }
  0xb2   :  { %850 = vmatpush1.bf16.msra.mxu0 %v1700_v63  ;;  %1511 = vmatprep.subr.bf16.mxu1 %v1754_v5  ;;  %v1737_v63 = vld [vmem:[#allocation8 + $0x1b0] ss:$8 sps:$4 sm:$0xff]  }
  0xb3   :  { %851 = vmatprep.subr.bf16.mxu0 %v1701_v0  ;;  %v1742_v0 = vld [vmem:[#allocation8 + $0x1c4] ss:$8 sps:$4 sm:$0xff]  }
  0xb5   :  { %1512 = vmatpush3.bf16.msra.mxu1 %v1755_v6  ;;  %v1748_v6 = vld [vmem:[#allocation8 + $0x1e4] ss:$8 sps:$4 sm:$0xff]  }
  0xb6   :  { %852 = vmatpush1.bf16.msra.mxu0 %v1703_v1  ;;  %1513 = vmatprep.subr.bf16.mxu1 %v1756_v7  ;;  %v1740_v1 = vld [vmem:[#allocation8 + $0x1c0] ss:$8 sps:$4 sm:$0xff]  }
  0xb7   :  { %862 = vmatprep.subr.bf16.mxu0 %v1706_v2  ;;  %v165_v2 = vsub.s32 2, %v2146_v16  ;;  %v1746_v7 = vld [vmem:[#allocation8 + $0x1e0] ss:$8 sps:$4 sm:$0xff]  }
  0xb8   :  { %v1769_v16 = vld [vmem:[%s2268_s7 + $0x8] sm:$0xff]  }
  0xb9   :  { %1514 = vmatpush3.bf16.msra.mxu1 %v1757_v8  ;;  %v166_v5 = vrot.slane %v2149_v18, %v165_v2  ;;  %v1767_v18 = vld [vmem:[%s2266_s5 + $0x38] sm:$0xff]  }
  0xba   :  { %1515 = vmatprep.subr.bf16.mxu1 %v1758_v9  ;;  %v1751_v9 = vld [vmem:[#allocation8 + $0x1f4] ss:$8 sps:$4 sm:$0xff]  }
  0xbd   :  { %1516 = vmatpush3.bf16.msra.mxu1 %v1759_v10  ;;  %v1749_v10 = vld [vmem:[#allocation8 + $0x1f0] ss:$8 sps:$4 sm:$0xff]  }
  0xbe   :  { %1517 = vmatprep.subr.bf16.mxu1 %v1760_v11 }
  0xc1   :  { %1518 = vmatpush3.bf16.msra.mxu1 %v1761_v12 }
  0xc2   :  { %1519 = vmatprep.subr.bf16.mxu1 %v1762_v13  ;;  %v1764_v13 = vld [vmem:[%s2266_s5 + $0x70] sm:$0xff]  }
  0xc5   :  { %1520 = vmatpush3.bf16.msra.mxu1 %v1763_v14  ;;  %v1765_v14 = vld [vmem:[%s2266_s5 + $0x30] sm:$0xff]  }
  0xc6   :  { %1521 = vmatprep.subr.bf16.mxu1 %v1764_v13 }
  0xc9   :  { %1522 = vmatpush3.bf16.msra.mxu1 %v1765_v14 }
  0xca   :  { %1523 = vmatprep.subr.bf16.mxu1 %v1766_v15 }
  0xcd   :  { %1524 = vmatpush3.bf16.msra.mxu1 %v1767_v18 }
 0x163   :  { %v369_v22 = vpop.f32.mrb[0].mxu1 }
 0x164   :  { %v370_v23 = vadd.f32 %v369_v22, %v158_v20  ;;  %v371_v24 = vpop.f32.mrb[1].mxu1  ;;  %v1961_v20 = vmov 0.0  }
 0x165   :  { %v372_v25 = vadd.f32 %v371_v24, %v162_v21  ;;  %v373_v26 = vpop.f32.mrb[2].mxu1  ;;  %1548 = vmatprep.subr.bf16.mxu1 %v1961_v20  ;;  %v489_v21 = vld [vmem:[%s2265_s4] sm:$0x3] }
 0x166   :  { %v417_v27 = vmax.f32 %v370_v23, 0.0  ;;  %v374_v28 = vpop.f32.mrb[3].mxu1  ;;  %v494_v22 = vrot.slane %v489_v21, %v157_v17  ;;  %v498_v23 = vrot.slane %v489_v21, %v161_v19  ;;  %v1770_v17 = vld [vmem:[%s2268_s7 + $0x10] sm:$0xff]   ;;  %v1771_v19 = vld [vmem:[%s2268_s7 + $0x18] sm:$0xff]  }
 0x167   :  { %v418_v29 = vmax.f32 %v372_v25, 0.0 }
 0x168   :  { %v421_v32 = vpack.c.bf16 %v417_v27, %v417_v27 }
 0x169   :  { %v422_v30 = vpack.c.bf16 %v418_v29, %v418_v29 }
 0x16b   :  { %853 = vmatprep.mubr.bf16.mxu0 %v422_v30 }
 0x16c   :  { %854 = vmatmul.mubr.bf16.vlgmr.msra.gmra.mrb[0].mxu0 %v421_v32 }
 0x16d   :  { %863 = vmatpush1.bf16.msra.mxu0 %v1704_v31 }
 0x16e   :  { %864 = vmatprep.subr.bf16.mxu0 %v1709_v33  ;;  %v1768_v33 = vld [vmem:[%s2268_s7] sm:$0xff]  }
 0x171   :  { %865 = vmatpush1.bf16.msra.mxu0 %v1707_v34 }
 0x172   :  { %866 = vmatprep.subr.bf16.mxu0 %v1712_v35  ;;  %v1772_v35 = vld [vmem:[%s2268_s7 + $0x20] sm:$0xff]  }
 0x175   :  { %867 = vmatpush1.bf16.msra.mxu0 %v1710_v36  ;;  %v1773_v36 = vld [vmem:[%s2268_s7 + $0x28] sm:$0xff]  }
 0x176   :  { %868 = vmatprep.subr.bf16.mxu0 %v1715_v37  ;;  %v1774_v37 = vld [vmem:[%s2268_s7 + $0x30] sm:$0xff]  }
 0x179   :  { %869 = vmatpush1.bf16.msra.mxu0 %v1713_v38  ;;  %v1775_v38 = vld [vmem:[%s2268_s7 + $0x38] sm:$0xff]  }
 0x17a   :  { %870 = vmatprep.subr.bf16.mxu0 %v1718_v39  ;;  %v1776_v39 = vld [vmem:[%s2270_s9] sm:$0xff]  }
 0x17d   :  { %871 = vmatpush1.bf16.msra.mxu0 %v1716_v40  ;;  %v1777_v40 = vld [vmem:[%s2270_s9 + $0x8] sm:$0xff]  }
 0x17e   :  { %872 = vmatprep.subr.bf16.mxu0 %v1721_v41 }
 0x181   :  { %873 = vmatpush1.bf16.msra.mxu0 %v1719_v42  ;;  %v1473_v42 = vld [vmem:[#allocation10] ss:$0 sm:$0xff] }
 0x182   :  { %874 = vmatprep.subr.bf16.mxu0 %v1724_v44 }
 0x183   :  { %v410_v48 = vpop.f32.mrb[4].mxu1 }
 0x184   :  { %v412_v49 = vpop.f32.mrb[5].mxu1  ;;  %v411_v8 = vadd.f32 %v410_v48, %v166_v5 }
 0x185   :  { %875 = vmatpush1.bf16.msra.mxu0 %v1722_v45  ;;  %v413_v51 = vadd.f32 %v412_v49, %v170_v46  ;;  %v414_v52 = vpop.f32.mrb[6].mxu1 }
 0x186   :  { %876 = vmatprep.subr.bf16.mxu0 %v1727_v47  ;;  %v415_v54 = vpop.f32.mrb[7].mxu1  ;;  %v419_v11 = vmax.f32 %v411_v8, 0.0  ;;  %v1780_v52 = vld [vmem:[%s2272_s11] sm:$0xff]  }
 0x187   :  { %v420_v55 = vmax.f32 %v413_v51, 0.0  ;;  %v1779_v51 = vld [vmem:[%s2270_s9 + $0x18] sm:$0xff]  }
 0x188   :  { %v423_v12 = vpack.c.bf16 %v419_v11, %v419_v11 }
 0x189   :  { %877 = vmatpush1.bf16.msra.mxu0 %v1725_v50  ;;  %v424_v57 = vpack.c.bf16 %v420_v55, %v420_v55  ;;  %v1778_v50 = vld [vmem:[%s2270_s9 + $0x10] sm:$0xff]  }
 0x18a   :  { %878 = vmatprep.subr.bf16.mxu0 %v1730_v53  ;;  %v1490_v53 = vld [vmem:[#allocation11] ss:$0 sm:$0xff] }
 0x18b   :  { %894 = vmatprep.mubr.bf16.mxu0 %v424_v57 }
 0x18d   :  { %879 = vmatpush1.bf16.msra.mxu0 %v1728_v56 }
 0x18e   :  { %880 = vmatprep.subr.bf16.mxu0 %v1733_v58 }
 0x191   :  { %881 = vmatpush1.bf16.msra.mxu0 %v1731_v59 }
 0x192   :  { %882 = vmatprep.subr.bf16.mxu0 %v1736_v60 }
 0x195   :  { %883 = vmatpush1.bf16.msra.mxu0 %v1734_v61  ;;  %v1781_v61 = vld [vmem:[%s2272_s11 + $0x8] sm:$0xff]  }
 0x196   :  { %884 = vmatprep.subr.bf16.mxu0 %v1739_v62  ;;  %v1499_v62 = vld [vmem:[%s2271_s10] ss:$0 sm:$0xff]  ;;  %s1963_s10 = smov [#allocation13]  }
 0x197   :  { %s1365_s11 = sshll.u32 %s1963_s10, 4  ;;  %s1366_s11 = int_to_ptr.vmem [resolvable:$true] %s1365_s11 }
 0x198   :  { %p1923_p7 = scmp.lt.s32.totalorder %s1366_s11, %s1366_s11 }
 0x199   :  { %885 = vmatpush1.bf16.msra.mxu0 %v1737_v63 }
 0x19a   :  { %886 = vmatprep.subr.bf16.mxu0 %v1742_v0 }
 0x19d   :  { %887 = vmatpush1.bf16.msra.mxu0 %v1740_v1 }
 0x19e   :  { %888 = vmatprep.subr.bf16.mxu0 %v1745_v3 }
 0x1a1   :  { %889 = vmatpush1.bf16.msra.mxu0 %v1743_v4 }
 0x1a2   :  { %890 = vmatprep.subr.bf16.mxu0 %v1748_v6  ;;  %v1505_v6 = vld [vmem:[%s2273_s12] ss:$0 sm:$0xff]  ;;  %s1918_s12 = scalar_lea.vmem %s1366_s11, 128 }
 0x1a3   :  { %p1919_p6 = scmp.ne.s32.totalorder %s1366_s11, %s1918_s12  ;;  %p1924_p8 = scmp.lt.s32.totalorder %s1918_s12, %s1918_s12 }
 0x1a5   :  { %891 = vmatpush1.bf16.msra.mxu0 %v1746_v7  ;;  %p1925_p9 = por %p1924_p8, %p1923_p7 }
 0x1a6   :  { %892 = vmatprep.subr.bf16.mxu0 %v1751_v9 }
 0x1a7   :  { %p1926_p10 = pnand %p1925_p9, %p1919_p6 }
 0x1a9   :  { %893 = vmatpush1.bf16.msra.mxu0 %v1749_v10 }
 0x1aa   :  { %1568 = vmatprep.subr.bf16.mxu0 %v1961_v20 }
 0x1ac   :  { %895 = vmatmul.mubr.bf16.vlgmr.msra.gmra.mrb[0].mxu0 %v423_v12 }
 0x1ad   :  { %1576 = vmatprep.mubr.msk.bf16.mxu0 %vm1962_vm0, %v1961_v20  ;;  %1569 = vmatpush3.bf16.msra.mxu0 %v1776_v39 }
 0x1ae   :  { %1570 = vmatprep.subr.bf16.mxu0 %v1961_v20 }
 0x1b1   :  { %1571 = vmatpush3.bf16.msra.mxu0 %v1777_v40 }
 0x1b2   :  { %1572 = vmatprep.subr.bf16.mxu0 %v1961_v20 }
 0x1b5   :  { %1573 = vmatpush3.bf16.msra.mxu0 %v1778_v50 }
 0x1b6   :  { %1574 = vmatprep.subr.bf16.mxu0 %v1961_v20 }
 0x1b9   :  { %1575 = vmatpush3.bf16.msra.mxu0 %v1779_v51 }
 0x27f   :  { %v896_v24 = vpop.f32.mrb[0].mxu0 }
 0x280   :  { %v1588_v25 = vadd.f32 %v896_v24, %v494_v22  ;;  %v898_v26 = vpop.f32.mrb[1].mxu0 }
 0x281   :  { %v1589_v27 = vadd.f32 %v898_v26, %v498_v23  ;;  %v900_v28 = vpop.f32.mrb[2].mxu0 }
 0x282   :  { %v903_v29 = vmax.f32 %v1588_v25, 0.0  ;;  %v901_v30 = vpop.f32.mrb[3].mxu0 }
 0x283   :  { %v904_v31 = vmax.f32 %v1589_v27, 0.0 }
 0x284   :  { %v905_v34 = vpack.c.bf16 %v903_v29, %v903_v29 }
 0x285   :  { %v906_v32 = vpack.c.bf16 %v904_v31, %v904_v31 }
 0x287   :  { %1074 = vmatprep.mubr.bf16.mxu1 %v906_v32 }
 0x288   :  { %1075 = vmatmul.mubr.bf16.vlgmr.msra.gmra.mrb[8].mxu1 %v905_v34 }
 0x289   :  { %1549 = vmatpush3.bf16.msra.mxu1 %v1768_v33  ;;  %1564 = vmatprep.mubr.msk.bf16.mxu1 %vm1962_vm0, %v1961_v20 }
 0x28a   :  { %1550 = vmatprep.subr.bf16.mxu1 %v1961_v20 }
 0x28d   :  { %1551 = vmatpush3.bf16.msra.mxu1 %v1769_v16 }
 0x28e   :  { %1552 = vmatprep.subr.bf16.mxu1 %v1961_v20 }
 0x291   :  { %1553 = vmatpush3.bf16.msra.mxu1 %v1770_v17 }
 0x292   :  { %1554 = vmatprep.subr.bf16.mxu1 %v1961_v20 }
 0x295   :  { %1555 = vmatpush3.bf16.msra.mxu1 %v1771_v19 }
 0x296   :  { %1556 = vmatprep.subr.bf16.mxu1 %v1961_v20 }
 0x299   :  { %1557 = vmatpush3.bf16.msra.mxu1 %v1772_v35 }
 0x29a   :  { %1558 = vmatprep.subr.bf16.mxu1 %v1961_v20 }
 0x29d   :  { %1559 = vmatpush3.bf16.msra.mxu1 %v1773_v36 }
 0x29e   :  { %1560 = vmatprep.subr.bf16.mxu1 %v1961_v20 }
 0x2a1   :  { %1561 = vmatpush3.bf16.msra.mxu1 %v1774_v37 }
 0x2a2   :  { %1562 = vmatprep.subr.bf16.mxu1 %v1961_v20 }
 0x2a5   :  { %1563 = vmatpush3.bf16.msra.mxu1 %v1775_v38 }
 0x2a6   :  { %1580 = vmatprep.subr.bf16.mxu1 %v1961_v20 }
 0x35b   :  { %v1525_v41 = vpop.f32.mrb[8].mxu1 }
 0x35c   :  { %v1526_v43 = vpop.f32.mrb[9].mxu1 }
 0x35d   :  { %v1527_v44 = vadd.f32 %v1526_v43, %v1525_v41  ;;  %v1528_v45 = vpop.f32.mrb[10].mxu1 }
 0x35e   :  { %v1529_v46 = vpop.f32.mrb[11].mxu1 }
 0x35f   :  { %v1077_v47 = vadd.f32 %v1527_v44, %v1473_v42 }
 0x361   :  { %v1082_v48 = vmax.f32 %v1077_v47, 0.0 }
 0x363   :  { %v1083_v49 = vpack.c.bf16 %v1082_v48, %v1082_v48 }
 0x365   :  { %1565 = vmatmul.mubr.bf16.vlgmr.msra.gmra.mrb[12].mxu1 %v1083_v49 }
 0x366   :  { %1584 = vmatprep.mubr.msk.bf16.mxu1 %vm1962_vm0, %v1961_v20  ;;  %1581 = vmatpush3.bf16.msra.mxu1 %v1780_v52 }
 0x367   :  { %1582 = vmatprep.subr.bf16.mxu1 %v1961_v20 }
 0x36a   :  { %1583 = vmatpush3.bf16.msra.mxu1 %v1781_v61 }
 0x438   :  { %v1189_v54 = vpop.f32.mrb[12].mxu1 }
 0x439   :  { %v1190_v55 = vadd.f32 %v1490_v53, %v1189_v54  ;;  %v1566_v56 = vpop.f32.mrb[13].mxu1 }
 0x43a   :  { %v1192_v57 = vpop.f32.mrb[14].mxu1 }
 0x43b   :  { %v1195_v58 = vmax.f32 %v1190_v55, 0.0  ;;  %v1567_v59 = vpop.f32.mrb[15].mxu1 }
 0x43d   :  { %v1196_v60 = vpack.c.bf16 %v1195_v58, %v1195_v58 }
 0x43f   :  { %1577 = vmatmul.mubr.msk.bf16.vlgmr.msra.gmra.mrb[4].mxu0 %vm1236_vm1, %v1196_v60 }
 0x512   :  { %v1274_v63 = vpop.f32.mrb[4].mxu0 }
 0x513   :  { %v1275_v0 = vadd.f32 %v1499_v62, %v1274_v63  ;;  %v1578_v1 = vpop.f32.mrb[5].mxu0 }
 0x514   :  { %v1277_v2 = vpop.f32.mrb[6].mxu0 }
 0x515   :  { %v1280_v3 = vmax.f32 %v1275_v0, 0.0  ;;  %v1579_v4 = vpop.f32.mrb[7].mxu0 }
 0x517   :  { %v1281_v5 = vpack.c.bf16 %v1280_v3, %v1280_v3 }
 0x519   :  { %1585 = vmatmul.mubr.msk.bf16.vlgmr.msra.gmra.mrb[16].mxu1 %vm1305_vm2, %v1281_v5 }
 0x5ec   :  { %v1343_v7 = vpop.f32.mrb[16].mxu1 }
 0x5ed   :  { %v1344_v8 = vadd.f32 %v1505_v6, %v1343_v7  ;;  %v1586_v9 = vpop.f32.mrb[17].mxu1 }
 0x5ee   :  { %v1346_v10 = vpop.f32.mrb[18].mxu1 }
 0x5ef   :  { %1349 = vmax.xlane.f32.xlu0 %v1344_v8  ;;  %v1587_v11 = vpop.f32.mrb[19].mxu1 }
 0x67c   :  { %v1350_v12 = vpop.xlane.xlu0 %1349 }
 0x67d   :  { %v1351_v13 = vsub.f32 %v1344_v8, %v1350_v12 }
 0x67f   :  { %v1352_v14 = vmul.f32 1.442695, %v1351_v13 }
 0x681   :  { %1782 = vpow2.f32 %v1352_v14 }
 0x68b   :  { %v1783_v15 = vpop.eup %1782 }
 0x68c   :  { %1354 = vadd.xlane.f32.xlu0 %v1783_v15 }
 0x719   :  { %v1355_v18 = vpop.xlane.xlu0 %1354 }
 0x71a   :  { %1784 = vrcp.f32 %v1355_v18 }
 0x724   :  { %v1785_v20 = vpop.eup %1784 }
 0x725   :  { %v1357_v21 = vmul.f32 %v1785_v20, %v1783_v15 }
 0x727   :  { %1358 = vst [vmem:[#allocation13] sm:$0xff] %v1357_v21 }
 0x728   :  { %1929 = shalt.err (!%p1926_p10)
}
 0x729   :  { %s1930_s0 = scalar_lea.hbm %s2274_s13, 128 }
 0x72a   :  { %p1931_p11 = scmp.ne.s32.totalorder %s2274_s13, %s1930_s0  ;;  %p1934_p12 = scmp.lt.u32.totalorder %s1930_s0, %s2274_s13 }
 0x72c   :  { %p1936_p13 = pnand %p1934_p12, %p1931_p11 }
 0x72e   :  { %1939 = shalt.err (!%p1936_p13)
}
 0x72f   :  { %1368 = dma.vmem_to_hbm [thread:$0]  %s1366_s11, 128, %s2274_s13, [#allocation4]  }
 0x730   :  { %1948 = dma.done.wait [#allocation4], 128  }
 0x731   :  { %1949 = vsyncadd [#allocation4], 4294967168 }
 0x732   :  { %1372 = vsyncpa [#allocation3], 1 }
 0x733   :  { %1373 = vsyncpa [#allocation6], 1 }
 0x734   :  { %1374 = vsyncpa [#allocation9], 1 }
 0x735   :  { %1375 = vsyncpa [#allocation12], 1 }
 0x736   :  { %1376 = vsyncpa [#allocation4], 1 }

</bundles_post_ra>
